<compile_context>
chip_gen: v7x
topology: tpu7x:2x2x1
jax: 0.10.0
libtpu: 0.0.40
codegen_flags: <defaults>
</compile_context>

<pallas_src>
import functools

import jax
import jax.numpy as jnp
from jax.experimental import pallas as pl
from jax.experimental.pallas import tpu as pltpu


def _round_up(x, m):
    return ((x + m - 1) // m) * m


def _ncdm_kernel(state_ref, kdiff_ref, edisc_ref, kp_ref,
                 w1_ref, b1_ref, w2_ref, b2_ref, w3_ref, b3_ref,
                 out_ref):
    # Element-wise interaction term (all f32 on the VPU/EUP).
    kd = jax.nn.sigmoid(kdiff_ref[...])                   # (TB, K)
    ed = jax.nn.sigmoid(edisc_ref[...])                   # (TB, 1)
    x = ed * (state_ref[...] - kd) * kp_ref[...]          # (TB, K) f32

    # prednet_full1 -> tanh    (MXU: bf16 operands, f32 accumulate)
    h1 = jnp.tanh(
        jnp.dot(x.astype(jnp.bfloat16), w1_ref[...],
                preferred_element_type=jnp.float32)
        + b1_ref[...])                                     # (TB, 512) f32

    # prednet_full2 -> tanh
    h2 = jnp.tanh(
        jnp.dot(h1.astype(jnp.bfloat16), w2_ref[...],
                preferred_element_type=jnp.float32)
        + b2_ref[...])                                     # (TB, 256) f32

    # prednet_full3 -> sigmoid.  256->1 done as VPU mul + XLU lane reduction
    # instead of an N=1 MXU matmul.
    logit = jnp.sum(h2 * w3_ref[...], axis=-1, keepdims=True) + b3_ref[...]
    out_ref[...] = jax.nn.sigmoid(logit)                   # (TB, 1)


def neural_cdm_forward(state_emb, input_exercise, input_knowledge_point,
                       params, *, tile_b=256):
    """Embedding gathers in plain JAX; interaction + MLP hot path in Pallas."""
    B, K = state_emb.shape

    # Embedding lookups (glue, wrapper-side).
    kdiff_raw = jnp.take(params["k_difficulty"], input_exercise, axis=0)      # (B, K)
    edisc_raw = jnp.take(params["e_discrimination"], input_exercise, axis=0)  # (B, 1)

    w1, b1 = params["w1"], params["b1"]            # (K, 512) bf16, (1, 512) f32
    w2, b2 = params["w2"], params["b2"]            # (512, 256) bf16, (1, 256) f32
    w3_row, b3 = params["w3_row"], params["b3"]    # (1, 256) f32, (1, 1) f32
    L1 = w1.shape[1]
    L2 = w2.shape[1]

    # Batch tile: multiple of 8 (f32 sublane), capped at tile_b to fill the MXU.
    tb = min(tile_b, _round_up(B, 8))
    Bp = _round_up(B, tb)
    if Bp != B:
        pad = ((0, Bp - B), (0, 0))
        state_emb = jnp.pad(state_emb, pad)
        kdiff_raw = jnp.pad(kdiff_raw, pad)
        edisc_raw = jnp.pad(edisc_raw, pad)
        input_knowledge_point = jnp.pad(input_knowledge_point, pad)

    def batch_spec(cols):
        return pl.BlockSpec((tb, cols), lambda i: (i, 0))

    def const_spec(shape):
        return pl.BlockSpec(shape, lambda i: (0, 0))

    o1 = pl.pallas_call(
        _ncdm_kernel,
        out_shape=jax.ShapeDtypeStruct((Bp, 1), jnp.float32),
        grid=(Bp // tb,),
        in_specs=[
            batch_spec(K),          # state_emb
            batch_spec(K),          # k_difficulty rows (pre-sigmoid)
            batch_spec(1),          # e_discrimination rows (pre-sigmoid)
            batch_spec(K),          # input_knowledge_point
            const_spec((K, L1)),    # w1 (bf16)
            const_spec((1, L1)),    # b1
            const_spec((L1, L2)),   # w2 (bf16)
            const_spec((1, L2)),    # b2
            const_spec((1, L2)),    # w3 as a row (f32)
            const_spec((1, 1)),     # b3
        ],
        out_specs=batch_spec(1),
        compiler_params=pltpu.CompilerParams(
            dimension_semantics=("parallel",)),
    )(state_emb, kdiff_raw, edisc_raw, input_knowledge_point,
      w1, b1, w2, b2, w3_row, b3)

    o1 = o1[:B]
    return jnp.concatenate([1.0 - o1, o1], axis=-1)


def _xavier_normal(key, fan_in, fan_out, shape):
    std = jnp.sqrt(2.0 / (fan_in + fan_out))
    return std * jax.random.normal(key, shape, dtype=jnp.float32)


def init_params(key, knowledge_dim, exer_n, len1=512, len2=256):
    ks = jax.random.split(key, 8)
    params = {}
    # Module xavier_normal_'s every param named '*weight*' (incl. embeddings).
    params["k_difficulty"] = _xavier_normal(ks[0], exer_n, knowledge_dim,
                                            (exer_n, knowledge_dim))
    params["e_discrimination"] = _xavier_normal(ks[1], exer_n, 1, (exer_n, 1))
    # Linear weights stored as (in, out) = W.T of PyTorch's (out, in).
    # w1/w2 are MXU operands -> bf16; w3 is used on the VPU -> keep f32 row.
    params["w1"] = _xavier_normal(ks[2], knowledge_dim, len1,
                                  (knowledge_dim, len1)).astype(jnp.bfloat16)
    params["b1"] = jnp.zeros((1, len1), jnp.float32)
    params["w2"] = _xavier_normal(ks[3], len1, len2,
                                  (len1, len2)).astype(jnp.bfloat16)
    params["b2"] = jnp.zeros((1, len2), jnp.float32)
    params["w3_row"] = _xavier_normal(ks[4], len2, 1, (len2, 1)).reshape(1, len2)
    params["b3"] = jnp.zeros((1, 1), jnp.float32)
    return params


def reference_forward(state_emb, input_exercise, input_knowledge_point, params):
    """Pure-JAX reference mirroring the kernel's numerics (bf16 MXU operands)."""
    kd = jax.nn.sigmoid(jnp.take(params["k_difficulty"], input_exercise, axis=0))
    ed = jax.nn.sigmoid(jnp.take(params["e_discrimination"], input_exercise, axis=0))
    x = ed * (state_emb - kd) * input_knowledge_point
    h1 = jnp.tanh(jnp.dot(x.astype(jnp.bfloat16), params["w1"],
                          preferred_element_type=jnp.float32) + params["b1"])
    h2 = jnp.tanh(jnp.dot(h1.astype(jnp.bfloat16), params["w2"],
                          preferred_element_type=jnp.float32) + params["b2"])
    o1 = jax.nn.sigmoid(jnp.sum(h2 * params["w3_row"], axis=-1, keepdims=True)
                        + params["b3"])
    return jnp.concatenate([1.0 - o1, o1], axis=-1)


if __name__ == "__main__":
    knowledge_dim = 32
    exer_n = 64
    batch = 8

    key = jax.random.PRNGKey(0)
    k_params, k_state, k_exer, k_kp = jax.random.split(key, 4)

    params = init_params(k_params, knowledge_dim, exer_n)

    # state_emb is an externally provided (already-sigmoided) student
    # knowledge-state embedding, as in the original pipeline.
    state_emb = jax.nn.sigmoid(
        jax.random.normal(k_state, (batch, knowledge_dim), dtype=jnp.float32))
    input_exercise = jax.random.randint(k_exer, (batch,), 0, exer_n,
                                        dtype=jnp.int32)
    input_knowledge_point = (
        jax.random.uniform(k_kp, (batch, knowledge_dim)) > 0.5
    ).astype(jnp.float32)

    fwd = jax.jit(functools.partial(neural_cdm_forward, params=params))
    out = jax.block_until_ready(
        fwd(state_emb, input_exercise, input_knowledge_point))

    ref = reference_forward(state_emb, input_exercise, input_knowledge_point,
                            params)
    assert out.shape == (batch, 2), out.shape
    assert jnp.allclose(out, ref, atol=1e-3, rtol=1e-3), (out, ref)
    assert jnp.allclose(out.sum(-1), 1.0, atol=1e-5)

    print("KERNEL_OK")
</pallas_src>

<mosaic_0001>
module attributes {stable_mosaic.version = 11 : i64} {
  func.func @_ncdm_kernel(%arg0: i32, %arg1: memref<8x32xf32, #tpu.memory_space<vmem>>, %arg2: memref<8x32xf32, #tpu.memory_space<vmem>>, %arg3: memref<8x1xf32, #tpu.memory_space<vmem>>, %arg4: memref<8x32xf32, #tpu.memory_space<vmem>>, %arg5: memref<32x512xbf16, #tpu.memory_space<vmem>>, %arg6: memref<1x512xf32, #tpu.memory_space<vmem>>, %arg7: memref<512x256xbf16, #tpu.memory_space<vmem>>, %arg8: memref<1x256xf32, #tpu.memory_space<vmem>>, %arg9: memref<1x256xf32, #tpu.memory_space<vmem>>, %arg10: memref<1x1xf32, #tpu.memory_space<vmem>>, %arg11: memref<8x1xf32, #tpu.memory_space<vmem>>) attributes {dimension_semantics = [#tpu.dimension_semantics<parallel>], iteration_bounds = array<i64: 1>, scalar_prefetch = 0 : i64, scratch_operands = 0 : i64, tpu.core_type = #tpu.core_type<tc>, window_params = [{transform_indices = @transform_0, window_bounds = array<i64: 8, 32>}, {transform_indices = @transform_1, window_bounds = array<i64: 8, 32>}, {transform_indices = @transform_2, window_bounds = array<i64: 8, 1>}, {transform_indices = @transform_3, window_bounds = array<i64: 8, 32>}, {pipeline_mode = #tpu.pipeline_mode<synchronous>, transform_indices = @transform_4, window_bounds = array<i64: 32, 512>}, {pipeline_mode = #tpu.pipeline_mode<synchronous>, transform_indices = @transform_5, window_bounds = array<i64: 1, 512>}, {pipeline_mode = #tpu.pipeline_mode<synchronous>, transform_indices = @transform_6, window_bounds = array<i64: 512, 256>}, {pipeline_mode = #tpu.pipeline_mode<synchronous>, transform_indices = @transform_7, window_bounds = array<i64: 1, 256>}, {pipeline_mode = #tpu.pipeline_mode<synchronous>, transform_indices = @transform_8, window_bounds = array<i64: 1, 256>}, {pipeline_mode = #tpu.pipeline_mode<synchronous>, transform_indices = @transform_9, window_bounds = array<i64: 1, 1>}, {transform_indices = @transform_10, window_bounds = array<i64: 8, 1>}]} {
    %c0 = arith.constant 0 : index
    %c0_0 = arith.constant 0 : index
    %0 = vector.load %arg2[%c0, %c0_0] : memref<8x32xf32, #tpu.memory_space<vmem>>, vector<8x32xf32>
    %1 = arith.negf %0 : vector<8x32xf32>
    %2 = math.exp %1 : vector<8x32xf32>
    %cst = arith.constant 1.000000e+00 : f32
    %3 = vector.broadcast %cst : f32 to vector<8x32xf32>
    %4 = arith.addf %3, %2 : vector<8x32xf32>
    %5 = arith.divf %3, %4 : vector<8x32xf32>
    %c0_1 = arith.constant 0 : index
    %c0_2 = arith.constant 0 : index
    %6 = vector.load %arg3[%c0_1, %c0_2] : memref<8x1xf32, #tpu.memory_space<vmem>>, vector<8x1xf32>
    %7 = arith.negf %6 : vector<8x1xf32>
    %8 = math.exp %7 : vector<8x1xf32>
    %cst_3 = arith.constant 1.000000e+00 : f32
    %9 = vector.broadcast %cst_3 : f32 to vector<8x1xf32>
    %10 = arith.addf %9, %8 : vector<8x1xf32>
    %11 = arith.divf %9, %10 : vector<8x1xf32>
    %c0_4 = arith.constant 0 : index
    %c0_5 = arith.constant 0 : index
    %12 = vector.load %arg1[%c0_4, %c0_5] : memref<8x32xf32, #tpu.memory_space<vmem>>, vector<8x32xf32>
    %13 = arith.subf %12, %5 : vector<8x32xf32>
    %14 = vector.broadcast %11 : vector<8x1xf32> to vector<8x32xf32>
    %15 = arith.mulf %14, %13 : vector<8x32xf32>
    %c0_6 = arith.constant 0 : index
    %c0_7 = arith.constant 0 : index
    %16 = vector.load %arg4[%c0_6, %c0_7] : memref<8x32xf32, #tpu.memory_space<vmem>>, vector<8x32xf32>
    %17 = arith.mulf %15, %16 : vector<8x32xf32>
    %18 = arith.truncf %17 : vector<8x32xf32> to vector<8x32xbf16>
    %c0_8 = arith.constant 0 : index
    %c0_9 = arith.constant 0 : index
    %19 = vector.load %arg5[%c0_8, %c0_9] : memref<32x512xbf16, #tpu.memory_space<vmem>>, vector<32x512xbf16>
    %cst_10 = arith.constant dense<0.000000e+00> : vector<8x512xf32>
    %20 = tpu.matmul %18, %19, %cst_10 {dimension_numbers = #tpu.dot_dimension_numbers<[1], [0], [0], [1], [0, 0, 1, 1], [], []>} : vector<8x32xbf16>, vector<32x512xbf16>, vector<8x512xf32> -> vector<8x512xf32>
    %c0_11 = arith.constant 0 : index
    %c0_12 = arith.constant 0 : index
    %21 = vector.load %arg6[%c0_11, %c0_12] : memref<1x512xf32, #tpu.memory_space<vmem>>, vector<1x512xf32>
    %22 = vector.broadcast %21 : vector<1x512xf32> to vector<8x512xf32>
    %23 = arith.addf %20, %22 : vector<8x512xf32>
    %24 = math.tanh %23 : vector<8x512xf32>
    %25 = arith.truncf %24 : vector<8x512xf32> to vector<8x512xbf16>
    %c0_13 = arith.constant 0 : index
    %c0_14 = arith.constant 0 : index
    %26 = vector.load %arg7[%c0_13, %c0_14] : memref<512x256xbf16, #tpu.memory_space<vmem>>, vector<512x256xbf16>
    %cst_15 = arith.constant dense<0.000000e+00> : vector<8x256xf32>
    %27 = tpu.matmul %25, %26, %cst_15 {dimension_numbers = #tpu.dot_dimension_numbers<[1], [0], [0], [1], [0, 0, 1, 1], [], []>} : vector<8x512xbf16>, vector<512x256xbf16>, vector<8x256xf32> -> vector<8x256xf32>
    %c0_16 = arith.constant 0 : index
    %c0_17 = arith.constant 0 : index
    %28 = vector.load %arg8[%c0_16, %c0_17] : memref<1x256xf32, #tpu.memory_space<vmem>>, vector<1x256xf32>
    %29 = vector.broadcast %28 : vector<1x256xf32> to vector<8x256xf32>
    %30 = arith.addf %27, %29 : vector<8x256xf32>
    %31 = math.tanh %30 : vector<8x256xf32>
    %c0_18 = arith.constant 0 : index
    %c0_19 = arith.constant 0 : index
    %32 = vector.load %arg9[%c0_18, %c0_19] : memref<1x256xf32, #tpu.memory_space<vmem>>, vector<1x256xf32>
    %33 = vector.broadcast %32 : vector<1x256xf32> to vector<8x256xf32>
    %34 = arith.mulf %31, %33 : vector<8x256xf32>
    %cst_20 = arith.constant dense<0.000000e+00> : vector<8xf32>
    %35 = vector.multi_reduction <add>, %34, %cst_20 [1] : vector<8x256xf32> to vector<8xf32>
    %36 = vector.shape_cast %35 : vector<8xf32> to vector<8x1xf32>
    %c0_21 = arith.constant 0 : index
    %c0_22 = arith.constant 0 : index
    %37 = vector.load %arg10[%c0_21, %c0_22] : memref<1x1xf32, #tpu.memory_space<vmem>>, vector<1x1xf32>
    %38 = vector.broadcast %37 : vector<1x1xf32> to vector<8x1xf32>
    %39 = arith.addf %36, %38 : vector<8x1xf32>
    %40 = arith.negf %39 : vector<8x1xf32>
    %41 = math.exp %40 : vector<8x1xf32>
    %cst_23 = arith.constant 1.000000e+00 : f32
    %42 = vector.broadcast %cst_23 : f32 to vector<8x1xf32>
    %43 = arith.addf %42, %41 : vector<8x1xf32>
    %44 = arith.divf %42, %43 : vector<8x1xf32>
    %c0_24 = arith.constant 0 : index
    %c0_25 = arith.constant 0 : index
    %45 = vector.load %arg11[%c0_24, %c0_25] : memref<8x1xf32, #tpu.memory_space<vmem>>, vector<8x1xf32>
    tpu.vector_store %arg11[%c0_24, %c0_25], %44 {strides = array<i32>} : memref<8x1xf32, #tpu.memory_space<vmem>>, vector<8x1xf32>,
    return
  }
  func.func @transform_0(%arg0: i32) -> (i32, i32) {
    %c0_i32 = arith.constant 0 : i32
    %c0_i32_0 = arith.constant 0 : i32
    return %arg0, %c0_i32 : i32, i32
  }
  func.func @transform_1(%arg0: i32) -> (i32, i32) {
    %c0_i32 = arith.constant 0 : i32
    %c0_i32_0 = arith.constant 0 : i32
    return %arg0, %c0_i32 : i32, i32
  }
  func.func @transform_2(%arg0: i32) -> (i32, i32) {
    %c0_i32 = arith.constant 0 : i32
    %c0_i32_0 = arith.constant 0 : i32
    return %arg0, %c0_i32 : i32, i32
  }
  func.func @transform_3(%arg0: i32) -> (i32, i32) {
    %c0_i32 = arith.constant 0 : i32
    %c0_i32_0 = arith.constant 0 : i32
    return %arg0, %c0_i32 : i32, i32
  }
  func.func @transform_4(%arg0: i32) -> (i32, i32) {
    %c0_i32 = arith.constant 0 : i32
    %c0_i32_0 = arith.constant 0 : i32
    %c0_i32_1 = arith.constant 0 : i32
    return %c0_i32, %c0_i32_0 : i32, i32
  }
  func.func @transform_5(%arg0: i32) -> (i32, i32) {
    %c0_i32 = arith.constant 0 : i32
    %c0_i32_0 = arith.constant 0 : i32
    %c0_i32_1 = arith.constant 0 : i32
    return %c0_i32, %c0_i32_0 : i32, i32
  }
  func.func @transform_6(%arg0: i32) -> (i32, i32) {
    %c0_i32 = arith.constant 0 : i32
    %c0_i32_0 = arith.constant 0 : i32
    %c0_i32_1 = arith.constant 0 : i32
    return %c0_i32, %c0_i32_0 : i32, i32
  }
  func.func @transform_7(%arg0: i32) -> (i32, i32) {
    %c0_i32 = arith.constant 0 : i32
    %c0_i32_0 = arith.constant 0 : i32
    %c0_i32_1 = arith.constant 0 : i32
    return %c0_i32, %c0_i32_0 : i32, i32
  }
  func.func @transform_8(%arg0: i32) -> (i32, i32) {
    %c0_i32 = arith.constant 0 : i32
    %c0_i32_0 = arith.constant 0 : i32
    %c0_i32_1 = arith.constant 0 : i32
    return %c0_i32, %c0_i32_0 : i32, i32
  }
  func.func @transform_9(%arg0: i32) -> (i32, i32) {
    %c0_i32 = arith.constant 0 : i32
    %c0_i32_0 = arith.constant 0 : i32
    %c0_i32_1 = arith.constant 0 : i32
    return %c0_i32, %c0_i32_0 : i32, i32
  }
  func.func @transform_10(%arg0: i32) -> (i32, i32) {
    %c0_i32 = arith.constant 0 : i32
    %c0_i32_0 = arith.constant 0 : i32
    return %arg0, %c0_i32 : i32, i32
  }
}

</mosaic_0001>

<bundles_post_ra>
// kernel: neural_cdm_forward.1
= control target key start
LH: loop header
LB: loop body
LE: loop exit
PB: predicated region body
PF: predicated region fallthrough
CT: control target
= control target key end

     0   :  { %v960_v0 = vmov 0   ;;  %vm133_vm0 = vcmask 261120   ;;  %vm738_vm1 = vcmask 7168   ;;  %s1269_s2 = inlined_call_operand.vmem [shape: f32[8,1], index: 2, kind: input, shape index: {}]   ;;  %s1270_s4 = inlined_call_operand.vmem [shape: bf16[32,512], index: 4, kind: input, shape index: {}]   ;;  %s1271_s6 = inlined_call_operand.vmem [shape: bf16[512,256], index: 6, kind: input, shape index: {}]   ;;  %s1272_s1 = inlined_call_operand.vmem [shape: f32[8,32], index: 1, kind: input, shape index: {}]   ;;  %s1273_s0 = inlined_call_operand.vmem [shape: f32[8,32], index: 0, kind: input, shape index: {}]   ;;  %s1274_s3 = inlined_call_operand.vmem [shape: f32[8,32], index: 3, kind: input, shape index: {}]   ;;  %s1275_s5 = inlined_call_operand.vmem [shape: f32[1,512], index: 5, kind: input, shape index: {}]   ;;  %s1276_s9 = inlined_call_operand.<no memory space> [shape: f32[1,1], index: 9, kind: input, shape index: {}]   ;;  %s1277_s7 = inlined_call_operand.vmem [shape: f32[1,256], index: 7, kind: input, shape index: {}]   ;;  %s1278_s8 = inlined_call_operand.vmem [shape: f32[1,256], index: 8, kind: input, shape index: {}]   ;;  %s1279_s10 = inlined_call_operand.vmem [shape: f32[8,1], index: 10, kind: output, shape index: {}]  }
   0x1   :  { %827 = vset.pattern.permute.xlu0 %v960_v0  ;;  %v45_v1 = vld [vmem:[%s1269_s2] sm:$0xff]  ;;  %169 = vmatprep.mubr.bf16.mxu0 %v960_v0  ;;  %v830_v4 = vld [vmem:[%s1270_s4 + $0xc] ss:$16 sps:$4 sm:$0xff]   ;;  %v833_v6 = vld [vmem:[%s1270_s4 + $0x8] ss:$16 sps:$4 sm:$0xff]  }
   0x2   :  { %v745_v2 = vmul.f32 -1.442695, %v45_v1  ;;  %v828_v3 = vld [vmem:[%s1270_s4 + $0x4] ss:$16 sps:$4 sm:$0xff]   ;;  %210 = vmatprep.mubr.bf16.mxu1 %v960_v0  ;;  %v832_v5 = vld [vmem:[%s1270_s4] ss:$16 sps:$4 sm:$0xff]   ;;  %178 = vmatprep.subr.bf16.mxu1 %v830_v4 }
   0x3   :  { %137 = vmatprep.subr.bf16.mxu0 %v828_v3  ;;  %179 = vmatpush1.bf16.msra.mxu1 %v833_v6  ;;  %v834_v10 = vld [vmem:[%s1270_s4 + $0x24] ss:$16 sps:$4 sm:$0xff]   ;;  %v836_v11 = vld [vmem:[%s1270_s4 + $0x2c] ss:$16 sps:$4 sm:$0xff]   ;;  %v838_v12 = vld [vmem:[%s1270_s4 + $0x20] ss:$16 sps:$4 sm:$0xff]  }
   0x4   :  { %936 = vpow2.f32 %v745_v2  ;;  %138 = vmatpush1.bf16.msra.mxu0 %v832_v5  ;;  %v839_v13 = vld [vmem:[%s1270_s4 + $0x28] ss:$16 sps:$4 sm:$0xff]   ;;  %180 = vmatprep.subr.bf16.mxu1 %v836_v11  ;;  %v842_v14 = vld [vmem:[%s1271_s6 + $0x4] ss:$8 sps:$4 sm:$0xff]   ;;  %v848_v30 = vld [vmem:[%s1271_s6 + $0x14] ss:$8 sps:$4 sm:$0xff]  }
   0x5   :  { %139 = vmatprep.subr.bf16.mxu0 %v834_v10  ;;  %v845_v15 = vld [vmem:[%s1271_s6 + $0x104] ss:$8 sps:$4 sm:$0xff]   ;;  %v840_v27 = vld [vmem:[%s1271_s6] ss:$8 sps:$4 sm:$0xff]   ;;  %v851_v31 = vld [vmem:[%s1271_s6 + $0x114] ss:$8 sps:$4 sm:$0xff]  }
   0x6   :  { %v38_v16 = vld [vmem:[%s1272_s1] sm:$0xff]  ;;  %v846_v32 = vld [vmem:[%s1271_s6 + $0x10] ss:$8 sps:$4 sm:$0xff]   ;;  %v860_v38 = vld [vmem:[%s1271_s6 + $0x34] ss:$8 sps:$4 sm:$0xff]  }
   0x7   :  { %181 = vmatpush1.bf16.msra.mxu1 %v839_v13  ;;  %v744_v17 = vmul.f32 -1.442695, %v38_v16  ;;  %v52_v21 = vld [vmem:[%s1273_s0] sm:$0xff]  ;;  %v849_v33 = vld [vmem:[%s1271_s6 + $0x110] ss:$8 sps:$4 sm:$0xff]  }
   0x8   :  { %140 = vmatpush1.bf16.msra.mxu0 %v838_v12  ;;  %623 = vmatprep.subr.bf16.mxu1 %v842_v14  ;;  %v60_v23 = vld [vmem:[%s1274_s3] sm:$0xff]  ;;  %v863_v39 = vld [vmem:[%s1271_s6 + $0x134] ss:$8 sps:$4 sm:$0xff]   ;;  %v858_v40 = vld [vmem:[%s1271_s6 + $0x30] ss:$8 sps:$4 sm:$0xff]  }
   0x9   :  { %664 = vmatprep.subr.bf16.mxu0 %v845_v15  ;;  %v843_v28 = vld [vmem:[%s1271_s6 + $0x100] ss:$8 sps:$4 sm:$0xff]   ;;  %v854_v34 = vld [vmem:[%s1271_s6 + $0x24] ss:$8 sps:$4 sm:$0xff]   ;;  %v861_v41 = vld [vmem:[%s1271_s6 + $0x130] ss:$8 sps:$4 sm:$0xff]  }
   0xa   :  { %v857_v35 = vld [vmem:[%s1271_s6 + $0x124] ss:$8 sps:$4 sm:$0xff]   ;;  %v852_v36 = vld [vmem:[%s1271_s6 + $0x20] ss:$8 sps:$4 sm:$0xff]   ;;  %v872_v46 = vld [vmem:[%s1271_s6 + $0x54] ss:$8 sps:$4 sm:$0xff]  }
   0xb   :  { %v855_v37 = vld [vmem:[%s1271_s6 + $0x120] ss:$8 sps:$4 sm:$0xff]   ;;  %v866_v42 = vld [vmem:[%s1271_s6 + $0x44] ss:$8 sps:$4 sm:$0xff]   ;;  %v875_v47 = vld [vmem:[%s1271_s6 + $0x154] ss:$8 sps:$4 sm:$0xff]  }
   0xc   :  { %v869_v43 = vld [vmem:[%s1271_s6 + $0x144] ss:$8 sps:$4 sm:$0xff]   ;;  %v864_v44 = vld [vmem:[%s1271_s6 + $0x40] ss:$8 sps:$4 sm:$0xff]   ;;  %v870_v48 = vld [vmem:[%s1271_s6 + $0x50] ss:$8 sps:$4 sm:$0xff]  }
   0xd   :  { %v867_v45 = vld [vmem:[%s1271_s6 + $0x140] ss:$8 sps:$4 sm:$0xff]   ;;  %v873_v49 = vld [vmem:[%s1271_s6 + $0x150] ss:$8 sps:$4 sm:$0xff]   ;;  %v878_v50 = vld [vmem:[%s1271_s6 + $0x64] ss:$8 sps:$4 sm:$0xff]  }
   0xe   :  { %v937_v7 = vpop.eup %936  ;;  %v881_v51 = vld [vmem:[%s1271_s6 + $0x164] ss:$8 sps:$4 sm:$0xff]   ;;  %v876_v52 = vld [vmem:[%s1271_s6 + $0x60] ss:$8 sps:$4 sm:$0xff]   ;;  %v884_v54 = vld [vmem:[%s1271_s6 + $0x74] ss:$8 sps:$4 sm:$0xff]  }
   0xf   :  { %v49_v8 = vadd.f32 1.0, %v937_v7  ;;  %v879_v53 = vld [vmem:[%s1271_s6 + $0x160] ss:$8 sps:$4 sm:$0xff]   ;;  %v887_v55 = vld [vmem:[%s1271_s6 + $0x174] ss:$8 sps:$4 sm:$0xff]  }
  0x10   :  { %v882_v56 = vld [vmem:[%s1271_s6 + $0x70] ss:$8 sps:$4 sm:$0xff]   ;;  %v890_v58 = vld [vmem:[%s1271_s6 + $0x84] ss:$8 sps:$4 sm:$0xff]   ;;  %v888_v60 = vld [vmem:[%s1271_s6 + $0x80] ss:$8 sps:$4 sm:$0xff]  }
  0x11   :  { %938 = vrcp.f32 %v49_v8  ;;  %v885_v57 = vld [vmem:[%s1271_s6 + $0x170] ss:$8 sps:$4 sm:$0xff]   ;;  %v893_v59 = vld [vmem:[%s1271_s6 + $0x184] ss:$8 sps:$4 sm:$0xff]   ;;  %v891_v61 = vld [vmem:[%s1271_s6 + $0x180] ss:$8 sps:$4 sm:$0xff]  }
  0x12   :  { %940 = vpow2.f32 %v744_v17  ;;  %v896_v62 = vld [vmem:[%s1271_s6 + $0x94] ss:$8 sps:$4 sm:$0xff]   ;;  %v894_v0 = vld [vmem:[%s1271_s6 + $0x90] ss:$8 sps:$4 sm:$0xff]   ;;  %v902_v2 = vld [vmem:[%s1271_s6 + $0xa4] ss:$8 sps:$4 sm:$0xff]  }
  0x13   :  { %v899_v63 = vld [vmem:[%s1271_s6 + $0x194] ss:$8 sps:$4 sm:$0xff]   ;;  %v897_v1 = vld [vmem:[%s1271_s6 + $0x190] ss:$8 sps:$4 sm:$0xff]   ;;  %v905_v3 = vld [vmem:[%s1271_s6 + $0x1a4] ss:$8 sps:$4 sm:$0xff]  }
  0x14   :  { %v900_v4 = vld [vmem:[%s1271_s6 + $0xa0] ss:$8 sps:$4 sm:$0xff]   ;;  %v908_v6 = vld [vmem:[%s1271_s6 + $0xb4] ss:$8 sps:$4 sm:$0xff]   ;;  %v906_v8 = vld [vmem:[%s1271_s6 + $0xb0] ss:$8 sps:$4 sm:$0xff]  }
  0x15   :  { %v903_v5 = vld [vmem:[%s1271_s6 + $0x1a0] ss:$8 sps:$4 sm:$0xff]   ;;  %v911_v7 = vld [vmem:[%s1271_s6 + $0x1b4] ss:$8 sps:$4 sm:$0xff]   ;;  %v914_v10 = vld [vmem:[%s1271_s6 + $0xc4] ss:$8 sps:$4 sm:$0xff]  }
  0x16   :  { %v917_v11 = vld [vmem:[%s1271_s6 + $0x1c4] ss:$8 sps:$4 sm:$0xff]   ;;  %v912_v12 = vld [vmem:[%s1271_s6 + $0xc0] ss:$8 sps:$4 sm:$0xff]   ;;  %v920_v14 = vld [vmem:[%s1271_s6 + $0xd4] ss:$8 sps:$4 sm:$0xff]  }
  0x17   :  { %v915_v13 = vld [vmem:[%s1271_s6 + $0x1c0] ss:$8 sps:$4 sm:$0xff]   ;;  %v923_v15 = vld [vmem:[%s1271_s6 + $0x1d4] ss:$8 sps:$4 sm:$0xff]   ;;  %v918_v16 = vld [vmem:[%s1271_s6 + $0xd0] ss:$8 sps:$4 sm:$0xff]  }
  0x18   :  { %v921_v17 = vld [vmem:[%s1271_s6 + $0x1d0] ss:$8 sps:$4 sm:$0xff]  }
  0x1b   :  { %v939_v9 = vpop.eup %938 }
  0x1c   :  { %56 = vperm.xlu0 %827, %v939_v9   ;;  %v941_v18 = vpop.eup %940  ;;  %v909_v9 = vld [vmem:[%s1271_s6 + $0x1b0] ss:$8 sps:$4 sm:$0xff]  }
  0x1d   :  { %v42_v19 = vadd.f32 1.0, %v941_v18  ;;  %v926_v18 = vld [vmem:[%s1271_s6 + $0xe4] ss:$8 sps:$4 sm:$0xff]  }
  0x1f   :  { %942 = vrcp.f32 %v42_v19  ;;  %v929_v19 = vld [vmem:[%s1271_s6 + $0x1e4] ss:$8 sps:$4 sm:$0xff]  }
  0x29   :  { %v943_v20 = vpop.eup %942 }
  0x2a   :  { %v53_v22 = vsub.f32 %v52_v21, %v943_v20  ;;  %v924_v20 = vld [vmem:[%s1271_s6 + $0xe0] ss:$8 sps:$4 sm:$0xff]  }
  0x2b   :  { %v927_v21 = vld [vmem:[%s1271_s6 + $0x1e0] ss:$8 sps:$4 sm:$0xff]  }
  0x9b   :  { %v57_v24 = vpop.permute.xlu0 %56 }
  0x9c   :  { %v59_v25 = vmul.f32 %v57_v24, %v53_v22  ;;  %v932_v22 = vld [vmem:[%s1271_s6 + $0xf4] ss:$8 sps:$4 sm:$0xff]   ;;  %v930_v24 = vld [vmem:[%s1271_s6 + $0xf0] ss:$8 sps:$4 sm:$0xff]  }
  0x9e   :  { %v61_v26 = vmul.f32 %v60_v23, %v59_v25  ;;  %v935_v23 = vld [vmem:[%s1271_s6 + $0x1f4] ss:$8 sps:$4 sm:$0xff]   ;;  %v933_v25 = vld [vmem:[%s1271_s6 + $0x1f0] ss:$8 sps:$4 sm:$0xff]  }
  0xa0   :  { %v62_v29 = vpack.c.bf16 %v61_v26, %v61_v26  ;;  %v73_v26 = vlaneseq }
  0xa2   :  { %754 = vmatmul.mubr.msk.bf16.vlgmr.msra.gmra.mrb[0].mxu0 %vm133_vm0, %v62_v29  ;;  %755 = vmatmul.mubr.msk.bf16.vlgmr.msra.gmra.mrb[0].mxu1 %vm133_vm0, %v62_v29 }
  0xa3   :  { %624 = vmatpush1.bf16.msra.mxu1 %v840_v27  ;;  %665 = vmatpush1.bf16.msra.mxu0 %v843_v28  ;;  %v74_v27 = vshrl.u32 %v73_v26, 7 }
  0xa4   :  { %625 = vmatprep.subr.bf16.mxu1 %v848_v30  ;;  %666 = vmatprep.subr.bf16.mxu0 %v851_v31  ;;  %v71_v30 = vld [vmem:[%s1275_s5] sm:$0xf] }
  0xa5   :  { %v1244_v28 = vsub.s32 0, %v74_v27  ;;  %v83_v29 = vsub.s32 2, %v74_v27  ;;  %v1249_v31 = vsub.s32 1, %v74_v27 }
  0xa7   :  { %626 = vmatpush1.bf16.msra.mxu1 %v846_v32  ;;  %667 = vmatpush1.bf16.msra.mxu0 %v849_v33  ;;  %v87_v32 = vsub.s32 3, %v74_v27  ;;  %v76_v33 = vrot.slane %v71_v30, %v1244_v28 }
  0xa8   :  { %627 = vmatprep.subr.bf16.mxu1 %v854_v34  ;;  %668 = vmatprep.subr.bf16.mxu0 %v857_v35  ;;  %v84_v34 = vrot.slane %v71_v30, %v83_v29  ;;  %v80_v35 = vrot.slane %v71_v30, %v1249_v31 }
  0xab   :  { %628 = vmatpush1.bf16.msra.mxu1 %v852_v36  ;;  %669 = vmatpush1.bf16.msra.mxu0 %v855_v37  ;;  %v88_v36 = vrot.slane %v71_v30, %v87_v32 }
  0xac   :  { %629 = vmatprep.subr.bf16.mxu1 %v860_v38  ;;  %670 = vmatprep.subr.bf16.mxu0 %v863_v39 }
  0xaf   :  { %630 = vmatpush1.bf16.msra.mxu1 %v858_v40  ;;  %671 = vmatpush1.bf16.msra.mxu0 %v861_v41 }
  0xb0   :  { %631 = vmatprep.subr.bf16.mxu1 %v866_v42  ;;  %672 = vmatprep.subr.bf16.mxu0 %v869_v43 }
  0xb3   :  { %632 = vmatpush1.bf16.msra.mxu1 %v864_v44  ;;  %673 = vmatpush1.bf16.msra.mxu0 %v867_v45 }
  0xb4   :  { %633 = vmatprep.subr.bf16.mxu1 %v872_v46  ;;  %674 = vmatprep.subr.bf16.mxu0 %v875_v47 }
  0xb7   :  { %634 = vmatpush1.bf16.msra.mxu1 %v870_v48  ;;  %675 = vmatpush1.bf16.msra.mxu0 %v873_v49 }
  0xb8   :  { %635 = vmatprep.subr.bf16.mxu1 %v878_v50  ;;  %676 = vmatprep.subr.bf16.mxu0 %v881_v51 }
  0xbb   :  { %636 = vmatpush1.bf16.msra.mxu1 %v876_v52  ;;  %677 = vmatpush1.bf16.msra.mxu0 %v879_v53 }
  0xbc   :  { %637 = vmatprep.subr.bf16.mxu1 %v884_v54  ;;  %678 = vmatprep.subr.bf16.mxu0 %v887_v55 }
  0xbf   :  { %638 = vmatpush1.bf16.msra.mxu1 %v882_v56  ;;  %679 = vmatpush1.bf16.msra.mxu0 %v885_v57  ;;  %v15_v57 = vstv %s1276_s9 }
  0xc0   :  { %639 = vmatprep.subr.bf16.mxu1 %v890_v58  ;;  %680 = vmatprep.subr.bf16.mxu0 %v893_v59  ;;  %16 = vst [vmem:[#allocation2] sm:$0x1] %v15_v57  ;;  %v291_v58 = vld [vmem:[%s1277_s7] sm:$0x3] }
  0xc1   :  { %v296_v59 = vrot.slane %v291_v58, %v1244_v28 }
  0xc3   :  { %640 = vmatpush1.bf16.msra.mxu1 %v888_v60  ;;  %681 = vmatpush1.bf16.msra.mxu0 %v891_v61  ;;  %v300_v60 = vrot.slane %v291_v58, %v1249_v31 }
  0xc4   :  { %641 = vmatprep.subr.bf16.mxu1 %v896_v62  ;;  %682 = vmatprep.subr.bf16.mxu0 %v899_v63 }
  0xc7   :  { %642 = vmatpush1.bf16.msra.mxu1 %v894_v0  ;;  %683 = vmatpush1.bf16.msra.mxu0 %v897_v1 }
  0xc8   :  { %643 = vmatprep.subr.bf16.mxu1 %v902_v2  ;;  %684 = vmatprep.subr.bf16.mxu0 %v905_v3 }
  0xcb   :  { %644 = vmatpush1.bf16.msra.mxu1 %v900_v4  ;;  %685 = vmatpush1.bf16.msra.mxu0 %v903_v5 }
  0xcc   :  { %645 = vmatprep.subr.bf16.mxu1 %v908_v6  ;;  %686 = vmatprep.subr.bf16.mxu0 %v911_v7 }
  0xcf   :  { %646 = vmatpush1.bf16.msra.mxu1 %v906_v8  ;;  %687 = vmatpush1.bf16.msra.mxu0 %v909_v9  ;;  %v707_v9 = vld [vmem:[%s1278_s8] sm:$0x3] }
  0xd0   :  { %647 = vmatprep.subr.bf16.mxu1 %v914_v10  ;;  %688 = vmatprep.subr.bf16.mxu0 %v917_v11  ;;  %v712_v10 = vrot.slane %v707_v9, %v1244_v28  ;;  %v716_v11 = vrot.slane %v707_v9, %v1249_v31 }
  0xd3   :  { %648 = vmatpush1.bf16.msra.mxu1 %v912_v12  ;;  %689 = vmatpush1.bf16.msra.mxu0 %v915_v13 }
  0xd4   :  { %649 = vmatprep.subr.bf16.mxu1 %v920_v14  ;;  %690 = vmatprep.subr.bf16.mxu0 %v923_v15 }
  0xd7   :  { %650 = vmatpush1.bf16.msra.mxu1 %v918_v16  ;;  %691 = vmatpush1.bf16.msra.mxu0 %v921_v17  ;;  %v820_v17 = vld [vmem:[#allocation2] ss:$0 sm:$0xff] }
  0xd8   :  { %651 = vmatprep.subr.bf16.mxu1 %v926_v18  ;;  %692 = vmatprep.subr.bf16.mxu0 %v929_v19 }
  0xdb   :  { %652 = vmatpush1.bf16.msra.mxu1 %v924_v20  ;;  %693 = vmatpush1.bf16.msra.mxu0 %v927_v21 }
  0xdc   :  { %653 = vmatprep.subr.bf16.mxu1 %v932_v22  ;;  %694 = vmatprep.subr.bf16.mxu0 %v935_v23 }
  0xdf   :  { %654 = vmatpush1.bf16.msra.mxu1 %v930_v24  ;;  %695 = vmatpush1.bf16.msra.mxu0 %v933_v25 }
 0x175   :  { %v171_v37 = vpop.f32.mrb[0].mxu0  ;;  %v212_v38 = vpop.f32.mrb[0].mxu1 }
 0x176   :  { %v172_v39 = vadd.f32 %v171_v37, %v76_v33  ;;  %v213_v40 = vadd.f32 %v212_v38, %v84_v34  ;;  %v173_v41 = vpop.f32.mrb[1].mxu0  ;;  %v214_v42 = vpop.f32.mrb[1].mxu1 }
 0x177   :  { %v174_v43 = vadd.f32 %v173_v41, %v80_v35  ;;  %v215_v44 = vadd.f32 %v214_v42, %v88_v36  ;;  %v175_v45 = vpop.f32.mrb[2].mxu0  ;;  %v216_v46 = vpop.f32.mrb[2].mxu1 }
 0x178   :  { %944 = vtanh.f32 %v172_v39  ;;  %v176_v47 = vpop.f32.mrb[3].mxu0  ;;  %v217_v48 = vpop.f32.mrb[3].mxu1 }
 0x179   :  { %946 = vtanh.f32 %v213_v40 }
 0x17a   :  { %948 = vtanh.f32 %v174_v43 }
 0x17b   :  { %950 = vtanh.f32 %v215_v44 }
 0x182   :  { %v945_v49 = vpop.eup %944 }
 0x183   :  { %v947_v50 = vpop.eup %946  ;;  %v223_v54 = vpack.c.bf16 %v945_v49, %v945_v49 }
 0x184   :  { %v949_v51 = vpop.eup %948  ;;  %v225_v56 = vpack.c.bf16 %v947_v50, %v947_v50 }
 0x185   :  { %v951_v52 = vpop.eup %950  ;;  %v224_v53 = vpack.c.bf16 %v949_v51, %v949_v51 }
 0x186   :  { %v226_v55 = vpack.c.bf16 %v951_v52, %v951_v52 }
 0x187   :  { %655 = vmatprep.mubr.bf16.mxu1 %v224_v53 }
 0x188   :  { %696 = vmatprep.mubr.bf16.mxu0 %v226_v55  ;;  %656 = vmatmul.mubr.bf16.vlgmr.msra.gmra.mrb[4].mxu1 %v223_v54 }
 0x189   :  { %697 = vmatmul.mubr.bf16.vlgmr.msra.gmra.mrb[4].mxu0 %v225_v56 }
 0x25b   :  { %v657_v61 = vpop.f32.mrb[4].mxu1 }
 0x25c   :  { %v658_v62 = vadd.f32 %v657_v61, %v296_v59  ;;  %v698_v63 = vpop.f32.mrb[4].mxu0  ;;  %v659_v0 = vpop.f32.mrb[5].mxu1 }
 0x25d   :  { %v660_v1 = vadd.f32 %v659_v0, %v300_v60  ;;  %v700_v2 = vpop.f32.mrb[5].mxu0  ;;  %v661_v3 = vpop.f32.mrb[6].mxu1 }
 0x25e   :  { %v699_v4 = vadd.f32 %v698_v63, %v658_v62  ;;  %v702_v5 = vpop.f32.mrb[6].mxu0  ;;  %v662_v6 = vpop.f32.mrb[7].mxu1 }
 0x25f   :  { %v701_v7 = vadd.f32 %v700_v2, %v660_v1  ;;  %v703_v8 = vpop.f32.mrb[7].mxu0 }
 0x260   :  { %952 = vtanh.f32 %v699_v4 }
 0x261   :  { %954 = vtanh.f32 %v701_v7 }
 0x26a   :  { %v953_v12 = vpop.eup %952 }
 0x26b   :  { %v955_v13 = vpop.eup %954  ;;  %v719_v14 = vmul.f32 %v953_v12, %v712_v10 }
 0x26c   :  { %v720_v15 = vmul.f32 %v955_v13, %v716_v11 }
 0x26e   :  { %v721_v16 = vadd.f32 %v720_v15, %v719_v14 }
 0x270   :  { %722 = vadd.xlane.f32.xlu0 %v721_v16 }
 0x2fd   :  { %v723_v18 = vpop.xlane.xlu0 %722 }
 0x2fe   :  { %v731_v19 = vadd.f32 %v820_v17, %v723_v18 }
 0x300   :  { %v821_v20 = vmul.f32 -1.442695, %v731_v19 }
 0x302   :  { %956 = vpow2.f32 %v821_v20 }
 0x30c   :  { %v957_v21 = vpop.eup %956 }
 0x30d   :  { %v735_v22 = vadd.f32 1.0, %v957_v21 }
 0x30f   :  { %958 = vrcp.f32 %v735_v22 }
 0x319   :  { %v959_v23 = vpop.eup %958 }
 0x31a   :  { %739 = vst.msk [vmem:[%s1279_s10] sm:$0xff] %vm738_vm1, %v959_v23 }

</bundles_post_ra>
